<compile_context>
chip_gen: v6e
topology: v6e:2x2x1
jax: 0.10.0
libtpu: 0.0.40
codegen_flags: <defaults>
</compile_context>

<pallas_src>
import jax
import jax.numpy as jnp
import numpy as np
from jax.experimental import pallas as pl
from jax.experimental.pallas import tpu as pltpu

BN_EPS = 1e-5


def _round_up(n, m):
    return ((n + m - 1) // m) * m


def duration_predictor(x, params):
    """x: (B, T, C) float32 -> (B, T, 1) predicted log-durations."""
    B, T, C = x.shape
    BT = B * T
    P = _round_up(max(BT, 128), 128)               # lane-padded batch*time
    w1, p1, w2, p2, w3, p3, w4, b4 = params

    # ---- trace-time parameter folding ----
    #  * conv taps stacked along the contraction axis: W_stack = (C, K*C)
    #  * inference batch norm folded into per-channel scale/shift
    def fold(w, p):
        K = w.shape[0]
        w_stack = jnp.concatenate([w[k].T for k in range(K)], axis=1)   # (C, K*C)
        bias, gamma, beta, mean, var = p
        scale = gamma * jax.lax.rsqrt(var + BN_EPS)
        shift = beta - mean * scale
        return w_stack, jnp.stack([bias, scale, shift], axis=1)         # (C, 3)

    ws1, q1 = fold(w1, p1)
    ws2, q2 = fold(w2, p2)
    ws3, q3 = fold(w3, p3)
    K1, K2, K3 = int(w1.shape[0]), int(w2.shape[0]), int(w3.shape[0])

    # channels-on-sublanes / (batch*time)-on-lanes slab, lane-padded with zeros
    xt = x.reshape(BT, C).T                                             # (C, BT)
    xt = jnp.pad(xt, ((0, 0), (0, P - BT)))                             # (C, P)

    def kernel(x_ref, w1_ref, q1_ref, w2_ref, q2_ref, w3_ref, q3_ref,
               w4_ref, b4_ref, o_ref):
        # column index r = b*T + t on the lane axis, hoisted once
        # (JAX does not CSE broadcasts/iotas)
        cols = jax.lax.broadcasted_iota(jnp.int32, (C, P), 1)

        def col_mask(begin, Tv):
            # valid columns: local time t in [begin, begin+Tv); unrolled over B
            # (avoids vector integer remainder); padded cols never match.
            m = None
            for b in range(B):
                lo = b * T + begin
                mb = (cols >= lo) & (cols < lo + Tv)
                m = mb if m is None else (m | mb)
            return m

        def res_block(h, w_ref, q_ref, K):
            begin = (K - 1) // 2                    # ZeroTemporalPad split
            Tv = T - (K - 1)                        # valid conv output length
            bias = q_ref[:, 0:1]                    # (C, 1)
            scale = q_ref[:, 1:2]
            shift = q_ref[:, 2:3]

            if K == 1:
                hs = h                              # (C, P)
            else:
                # K time-shifted views stacked on the contraction (sublane)
                # axis; the non-circular shift is a cheap XLU lane rotation,
                # wrap-around handled by the column mask below.
                parts = []
                for k in range(K):
                    d = begin - k                   # static shift per tap
                    parts.append(
                        h if d == 0 else pltpu.roll(h, shift=d % P, axis=1))
                hs = jnp.concatenate(parts, axis=0)  # (K*C, P)

            # one MXU matmul per residual block, full K*C contraction depth
            z = jnp.dot(w_ref[...], hs, preferred_element_type=jnp.float32)
            z = z + bias
            if K > 1:
                z = jnp.where(col_mask(begin, Tv), z, 0.0)   # ZeroTemporalPad
            z = jnp.maximum(z, 0.0)                 # ReLU
            return h + (z * scale + shift)          # folded BN + residual

        h = x_ref[...].astype(jnp.float32)          # (C, P)
        h = res_block(h, w1_ref, q1_ref, K1)        # ResidualBlock(C, 4)
        h = res_block(h, w2_ref, q2_ref, K2)        # ResidualBlock(C, 3)
        h = res_block(h, w3_ref, q3_ref, K3)        # ResidualBlock(C, 1)

        # final Conv1d(C, 1, k=1): (1,C)@(C,P) -> lane-dense, lane-aligned row
        out = jnp.dot(w4_ref[...], h, preferred_element_type=jnp.float32)
        out = out + b4_ref[0, 0]
        o_ref[...] = out.astype(o_ref.dtype)

    def full_spec(a):
        nd = a.ndim
        return pl.BlockSpec(a.shape, lambda i, _nd=nd: (0,) * _nd)

    in_specs = [
        full_spec(xt),
        full_spec(ws1), full_spec(q1),
        full_spec(ws2), full_spec(q2),
        full_spec(ws3), full_spec(q3),
        full_spec(w4),
        pl.BlockSpec(memory_space=pltpu.MemorySpace.SMEM),   # scalar bias b4
    ]

    out = pl.pallas_call(
        kernel,
        out_shape=jax.ShapeDtypeStruct((1, P), x.dtype),
        grid_spec=pltpu.PrefetchScalarGridSpec(
            num_scalar_prefetch=0,
            grid=(1,),                        # single invocation: tiny problem
            in_specs=in_specs,
            out_specs=pl.BlockSpec((1, P), lambda i: (0, 0)),
        ),
        compiler_params=pltpu.CompilerParams(
            dimension_semantics=("arbitrary",)),
    )(xt, ws1, q1, ws2, q2, ws3, q3, w4, b4)

    return out[:, :BT].reshape(B, T, 1)


def reference(x, params):
    """Pure-JAX reference with the original (un-folded) semantics."""
    w1, p1, w2, p2, w3, p3, w4, b4 = params

    def res_block(h, w, p):
        K = w.shape[0]
        total = K - 1
        begin = total // 2
        end = total - begin
        Tv = h.shape[1] - total
        acc = sum(jnp.einsum('btc,cd->btd', h[:, k:k + Tv, :], w[k])
                  for k in range(K))
        acc = acc + p[0][None, None, :]
        y = jnp.pad(acc, ((0, 0), (begin, end), (0, 0)))
        y = jnp.maximum(y, 0.0)
        y = p[1] * (y - p[3]) * jax.lax.rsqrt(p[4] + BN_EPS) + p[2]
        return h + y

    h = res_block(x, w1, p1)
    h = res_block(h, w2, p2)
    h = res_block(h, w3, p3)
    return jnp.einsum('btc,c->bt', h, w4[0])[..., None] + b4[0, 0]


if __name__ == "__main__":
    key = jax.random.PRNGKey(0)
    B, T, C = 2, 16, 32        # small synthetic shapes (hp.channels -> 32)
    keys = jax.random.split(key, 8)

    x = jax.random.normal(keys[0], (B, T, C), jnp.float32)

    def make_block_params(k, K):
        k1, k2, k3, k4, k5, k6 = jax.random.split(k, 6)
        w = jax.random.normal(k1, (K, C, C), jnp.float32) / jnp.sqrt(K * C)
        bias = jax.random.normal(k2, (C,), jnp.float32) * 0.1
        gamma = jax.random.uniform(k3, (C,), jnp.float32, 0.5, 1.5)
        beta = jax.random.normal(k4, (C,), jnp.float32) * 0.1
        mean = jax.random.normal(k5, (C,), jnp.float32) * 0.1
        var = jax.random.uniform(k6, (C,), jnp.float32, 0.5, 1.5)
        p = jnp.stack([bias, gamma, beta, mean, var], axis=0)  # (5, C)
        return w, p

    w1, p1 = make_block_params(keys[1], 4)   # ResidualBlock(C, 4, 1, n=1)
    w2, p2 = make_block_params(keys[2], 3)   # ResidualBlock(C, 3, 1, n=1)
    w3, p3 = make_block_params(keys[3], 1)   # ResidualBlock(C, 1, 1, n=1)
    w4 = jax.random.normal(keys[4], (1, C), jnp.float32) / jnp.sqrt(C)
    b4 = jax.random.normal(keys[5], (1, 1), jnp.float32) * 0.1

    params = (w1, p1, w2, p2, w3, p3, w4, b4)

    out = jax.block_until_ready(duration_predictor(x, params))
    assert out.shape == (B, T, 1)

    ref = jax.block_until_ready(reference(x, params))
    np.testing.assert_allclose(np.asarray(out), np.asarray(ref),
                               rtol=1e-5, atol=1e-5)
    print("KERNEL_OK")
</pallas_src>

<mosaic_0001>
module attributes {stable_mosaic.version = 11 : i64} {
  func.func @kernel(%arg0: i32, %arg1: memref<32x128xf32, #tpu.memory_space<vmem>>, %arg2: memref<32x128xf32, #tpu.memory_space<vmem>>, %arg3: memref<32x3xf32, #tpu.memory_space<vmem>>, %arg4: memref<32x96xf32, #tpu.memory_space<vmem>>, %arg5: memref<32x3xf32, #tpu.memory_space<vmem>>, %arg6: memref<32x32xf32, #tpu.memory_space<vmem>>, %arg7: memref<32x3xf32, #tpu.memory_space<vmem>>, %arg8: memref<1x32xf32, #tpu.memory_space<vmem>>, %arg9: memref<1x1xf32, #tpu.memory_space<smem>>, %arg10: memref<1x128xf32, #tpu.memory_space<vmem>>) attributes {dimension_semantics = [#tpu.dimension_semantics<arbitrary>], iteration_bounds = array<i64: 1>, scalar_prefetch = 0 : i64, scratch_operands = 0 : i64, tpu.core_type = #tpu.core_type<tc>, window_params = [{pipeline_mode = #tpu.pipeline_mode<synchronous>, transform_indices = @transform_0, window_bounds = array<i64: 32, 128>}, {pipeline_mode = #tpu.pipeline_mode<synchronous>, transform_indices = @transform_1, window_bounds = array<i64: 32, 128>}, {pipeline_mode = #tpu.pipeline_mode<synchronous>, transform_indices = @transform_2, window_bounds = array<i64: 32, 3>}, {pipeline_mode = #tpu.pipeline_mode<synchronous>, transform_indices = @transform_3, window_bounds = array<i64: 32, 96>}, {pipeline_mode = #tpu.pipeline_mode<synchronous>, transform_indices = @transform_4, window_bounds = array<i64: 32, 3>}, {pipeline_mode = #tpu.pipeline_mode<synchronous>, transform_indices = @transform_5, window_bounds = array<i64: 32, 32>}, {pipeline_mode = #tpu.pipeline_mode<synchronous>, transform_indices = @transform_6, window_bounds = array<i64: 32, 3>}, {pipeline_mode = #tpu.pipeline_mode<synchronous>, transform_indices = @transform_7, window_bounds = array<i64: 1, 32>}, {transform_indices = @transform_8, window_bounds = array<i64: 1, 1>}, {pipeline_mode = #tpu.pipeline_mode<synchronous>, transform_indices = @transform_9, window_bounds = array<i64: 1, 128>}]} {
    %0 = tpu.iota {dimensions = array<i32: 1>} : vector<32x128xi32>
    %c0 = arith.constant 0 : index
    %c0_0 = arith.constant 0 : index
    %1 = vector.load %arg1[%c0, %c0_0] : memref<32x128xf32, #tpu.memory_space<vmem>>, vector<32x128xf32>
    %c0_1 = arith.constant 0 : index
    %c0_2 = arith.constant 0 : index
    %2 = vector.load %arg3[%c0_1, %c0_2] : memref<32x3xf32, #tpu.memory_space<vmem>>, vector<32x1xf32>
    %c0_3 = arith.constant 0 : index
    %c1 = arith.constant 1 : index
    %3 = vector.load %arg3[%c0_3, %c1] : memref<32x3xf32, #tpu.memory_space<vmem>>, vector<32x1xf32>
    %c0_4 = arith.constant 0 : index
    %c2 = arith.constant 2 : index
    %4 = vector.load %arg3[%c0_4, %c2] : memref<32x3xf32, #tpu.memory_space<vmem>>, vector<32x1xf32>
    %c1_i32 = arith.constant 1 : i32
    %5 = tpu.dynamic_rotate %1 by %c1_i32 dim 1 : vector<32x128xf32>, i32 -> vector<32x128xf32>
    %c127_i32 = arith.constant 127 : i32
    %6 = tpu.dynamic_rotate %1 by %c127_i32 dim 1 : vector<32x128xf32>, i32 -> vector<32x128xf32>
    %c126_i32 = arith.constant 126 : i32
    %7 = tpu.dynamic_rotate %1 by %c126_i32 dim 1 : vector<32x128xf32>, i32 -> vector<32x128xf32>
    %8 = tpu.concatenate %5, %1, %6, %7 in 0 : vector<32x128xf32>, vector<32x128xf32>, vector<32x128xf32>, vector<32x128xf32> -> vector<128x128xf32>
    %c0_5 = arith.constant 0 : index
    %c0_6 = arith.constant 0 : index
    %9 = vector.load %arg2[%c0_5, %c0_6] : memref<32x128xf32, #tpu.memory_space<vmem>>, vector<32x128xf32>
    %cst = arith.constant dense<0.000000e+00> : vector<32x128xf32>
    %10 = tpu.matmul %9, %8, %cst {dimension_numbers = #tpu.dot_dimension_numbers<[1], [0], [0], [1], [0, 0, 1, 1], [], []>} : vector<32x128xf32>, vector<128x128xf32>, vector<32x128xf32> -> vector<32x128xf32>
    %11 = vector.broadcast %2 : vector<32x1xf32> to vector<32x128xf32>
    %12 = arith.addf %10, %11 : vector<32x128xf32>
    %c1_i32_7 = arith.constant 1 : i32
    %13 = vector.broadcast %c1_i32_7 : i32 to vector<32x128xi32>
    %14 = arith.cmpi sge, %0, %13 : vector<32x128xi32>
    %c14_i32 = arith.constant 14 : i32
    %15 = vector.broadcast %c14_i32 : i32 to vector<32x128xi32>
    %16 = arith.cmpi slt, %0, %15 : vector<32x128xi32>
    %17 = arith.andi %14, %16 : vector<32x128xi1>
    %c17_i32 = arith.constant 17 : i32
    %18 = vector.broadcast %c17_i32 : i32 to vector<32x128xi32>
    %19 = arith.cmpi sge, %0, %18 : vector<32x128xi32>
    %c30_i32 = arith.constant 30 : i32
    %20 = vector.broadcast %c30_i32 : i32 to vector<32x128xi32>
    %21 = arith.cmpi slt, %0, %20 : vector<32x128xi32>
    %22 = arith.andi %19, %21 : vector<32x128xi1>
    %23 = arith.ori %17, %22 : vector<32x128xi1>
    %cst_8 = arith.constant 0.000000e+00 : f32
    %24 = vector.broadcast %cst_8 : f32 to vector<32x128xf32>
    %25 = arith.select %23, %12, %24 : vector<32x128xi1>, vector<32x128xf32>
    %cst_9 = arith.constant 0.000000e+00 : f32
    %26 = vector.broadcast %cst_9 : f32 to vector<32x128xf32>
    %27 = arith.maximumf %25, %26 : vector<32x128xf32>
    %28 = vector.broadcast %3 : vector<32x1xf32> to vector<32x128xf32>
    %29 = arith.mulf %27, %28 : vector<32x128xf32>
    %30 = vector.broadcast %4 : vector<32x1xf32> to vector<32x128xf32>
    %31 = arith.addf %29, %30 : vector<32x128xf32>
    %32 = arith.addf %1, %31 : vector<32x128xf32>
    %c0_10 = arith.constant 0 : index
    %c0_11 = arith.constant 0 : index
    %33 = vector.load %arg5[%c0_10, %c0_11] : memref<32x3xf32, #tpu.memory_space<vmem>>, vector<32x1xf32>
    %c0_12 = arith.constant 0 : index
    %c1_13 = arith.constant 1 : index
    %34 = vector.load %arg5[%c0_12, %c1_13] : memref<32x3xf32, #tpu.memory_space<vmem>>, vector<32x1xf32>
    %c0_14 = arith.constant 0 : index
    %c2_15 = arith.constant 2 : index
    %35 = vector.load %arg5[%c0_14, %c2_15] : memref<32x3xf32, #tpu.memory_space<vmem>>, vector<32x1xf32>
    %c1_i32_16 = arith.constant 1 : i32
    %36 = tpu.dynamic_rotate %32 by %c1_i32_16 dim 1 : vector<32x128xf32>, i32 -> vector<32x128xf32>
    %c127_i32_17 = arith.constant 127 : i32
    %37 = tpu.dynamic_rotate %32 by %c127_i32_17 dim 1 : vector<32x128xf32>, i32 -> vector<32x128xf32>
    %38 = tpu.concatenate %36, %32, %37 in 0 : vector<32x128xf32>, vector<32x128xf32>, vector<32x128xf32> -> vector<96x128xf32>
    %c0_18 = arith.constant 0 : index
    %c0_19 = arith.constant 0 : index
    %39 = vector.load %arg4[%c0_18, %c0_19] : memref<32x96xf32, #tpu.memory_space<vmem>>, vector<32x96xf32>
    %cst_20 = arith.constant dense<0.000000e+00> : vector<32x128xf32>
    %40 = tpu.matmul %39, %38, %cst_20 {dimension_numbers = #tpu.dot_dimension_numbers<[1], [0], [0], [1], [0, 0, 1, 1], [], []>} : vector<32x96xf32>, vector<96x128xf32>, vector<32x128xf32> -> vector<32x128xf32>
    %41 = vector.broadcast %33 : vector<32x1xf32> to vector<32x128xf32>
    %42 = arith.addf %40, %41 : vector<32x128xf32>
    %c1_i32_21 = arith.constant 1 : i32
    %43 = vector.broadcast %c1_i32_21 : i32 to vector<32x128xi32>
    %44 = arith.cmpi sge, %0, %43 : vector<32x128xi32>
    %c15_i32 = arith.constant 15 : i32
    %45 = vector.broadcast %c15_i32 : i32 to vector<32x128xi32>
    %46 = arith.cmpi slt, %0, %45 : vector<32x128xi32>
    %47 = arith.andi %44, %46 : vector<32x128xi1>
    %c17_i32_22 = arith.constant 17 : i32
    %48 = vector.broadcast %c17_i32_22 : i32 to vector<32x128xi32>
    %49 = arith.cmpi sge, %0, %48 : vector<32x128xi32>
    %c31_i32 = arith.constant 31 : i32
    %50 = vector.broadcast %c31_i32 : i32 to vector<32x128xi32>
    %51 = arith.cmpi slt, %0, %50 : vector<32x128xi32>
    %52 = arith.andi %49, %51 : vector<32x128xi1>
    %53 = arith.ori %47, %52 : vector<32x128xi1>
    %cst_23 = arith.constant 0.000000e+00 : f32
    %54 = vector.broadcast %cst_23 : f32 to vector<32x128xf32>
    %55 = arith.select %53, %42, %54 : vector<32x128xi1>, vector<32x128xf32>
    %cst_24 = arith.constant 0.000000e+00 : f32
    %56 = vector.broadcast %cst_24 : f32 to vector<32x128xf32>
    %57 = arith.maximumf %55, %56 : vector<32x128xf32>
    %58 = vector.broadcast %34 : vector<32x1xf32> to vector<32x128xf32>
    %59 = arith.mulf %57, %58 : vector<32x128xf32>
    %60 = vector.broadcast %35 : vector<32x1xf32> to vector<32x128xf32>
    %61 = arith.addf %59, %60 : vector<32x128xf32>
    %62 = arith.addf %32, %61 : vector<32x128xf32>
    %c0_25 = arith.constant 0 : index
    %c0_26 = arith.constant 0 : index
    %63 = vector.load %arg7[%c0_25, %c0_26] : memref<32x3xf32, #tpu.memory_space<vmem>>, vector<32x1xf32>
    %c0_27 = arith.constant 0 : index
    %c1_28 = arith.constant 1 : index
    %64 = vector.load %arg7[%c0_27, %c1_28] : memref<32x3xf32, #tpu.memory_space<vmem>>, vector<32x1xf32>
    %c0_29 = arith.constant 0 : index
    %c2_30 = arith.constant 2 : index
    %65 = vector.load %arg7[%c0_29, %c2_30] : memref<32x3xf32, #tpu.memory_space<vmem>>, vector<32x1xf32>
    %c0_31 = arith.constant 0 : index
    %c0_32 = arith.constant 0 : index
    %66 = vector.load %arg6[%c0_31, %c0_32] : memref<32x32xf32, #tpu.memory_space<vmem>>, vector<32x32xf32>
    %cst_33 = arith.constant dense<0.000000e+00> : vector<32x128xf32>
    %67 = tpu.matmul %66, %62, %cst_33 {dimension_numbers = #tpu.dot_dimension_numbers<[1], [0], [0], [1], [0, 0, 1, 1], [], []>} : vector<32x32xf32>, vector<32x128xf32>, vector<32x128xf32> -> vector<32x128xf32>
    %68 = vector.broadcast %63 : vector<32x1xf32> to vector<32x128xf32>
    %69 = arith.addf %67, %68 : vector<32x128xf32>
    %cst_34 = arith.constant 0.000000e+00 : f32
    %70 = vector.broadcast %cst_34 : f32 to vector<32x128xf32>
    %71 = arith.maximumf %69, %70 : vector<32x128xf32>
    %72 = vector.broadcast %64 : vector<32x1xf32> to vector<32x128xf32>
    %73 = arith.mulf %71, %72 : vector<32x128xf32>
    %74 = vector.broadcast %65 : vector<32x1xf32> to vector<32x128xf32>
    %75 = arith.addf %73, %74 : vector<32x128xf32>
    %76 = arith.addf %62, %75 : vector<32x128xf32>
    %c0_35 = arith.constant 0 : index
    %c0_36 = arith.constant 0 : index
    %77 = vector.load %arg8[%c0_35, %c0_36] : memref<1x32xf32, #tpu.memory_space<vmem>>, vector<1x32xf32>
    %cst_37 = arith.constant dense<0.000000e+00> : vector<1x128xf32>
    %78 = tpu.matmul %77, %76, %cst_37 {dimension_numbers = #tpu.dot_dimension_numbers<[1], [0], [0], [1], [0, 0, 1, 1], [], []>} : vector<1x32xf32>, vector<32x128xf32>, vector<1x128xf32> -> vector<1x128xf32>
    %c0_38 = arith.constant 0 : index
    %c0_39 = arith.constant 0 : index
    %79 = memref.load %arg9[%c0_38, %c0_39] : memref<1x1xf32, #tpu.memory_space<smem>>
    %80 = vector.broadcast %79 : f32 to vector<1x128xf32>
    %81 = arith.addf %78, %80 : vector<1x128xf32>
    %c0_40 = arith.constant 0 : index
    %c0_41 = arith.constant 0 : index
    %82 = vector.load %arg10[%c0_40, %c0_41] : memref<1x128xf32, #tpu.memory_space<vmem>>, vector<1x128xf32>
    tpu.vector_store %arg10[%c0_40, %c0_41], %81 {strides = array<i32>} : memref<1x128xf32, #tpu.memory_space<vmem>>, vector<1x128xf32>,
    return
  }
  func.func @transform_0(%arg0: i32) -> (i32, i32) {
    %c0_i32 = arith.constant 0 : i32
    %c0_i32_0 = arith.constant 0 : i32
    %c0_i32_1 = arith.constant 0 : i32
    return %c0_i32, %c0_i32_0 : i32, i32
  }
  func.func @transform_1(%arg0: i32) -> (i32, i32) {
    %c0_i32 = arith.constant 0 : i32
    %c0_i32_0 = arith.constant 0 : i32
    %c0_i32_1 = arith.constant 0 : i32
    return %c0_i32, %c0_i32_0 : i32, i32
  }
  func.func @transform_2(%arg0: i32) -> (i32, i32) {
    %c0_i32 = arith.constant 0 : i32
    %c0_i32_0 = arith.constant 0 : i32
    %c0_i32_1 = arith.constant 0 : i32
    return %c0_i32, %c0_i32_0 : i32, i32
  }
  func.func @transform_3(%arg0: i32) -> (i32, i32) {
    %c0_i32 = arith.constant 0 : i32
    %c0_i32_0 = arith.constant 0 : i32
    %c0_i32_1 = arith.constant 0 : i32
    return %c0_i32, %c0_i32_0 : i32, i32
  }
  func.func @transform_4(%arg0: i32) -> (i32, i32) {
    %c0_i32 = arith.constant 0 : i32
    %c0_i32_0 = arith.constant 0 : i32
    %c0_i32_1 = arith.constant 0 : i32
    return %c0_i32, %c0_i32_0 : i32, i32
  }
  func.func @transform_5(%arg0: i32) -> (i32, i32) {
    %c0_i32 = arith.constant 0 : i32
    %c0_i32_0 = arith.constant 0 : i32
    %c0_i32_1 = arith.constant 0 : i32
    return %c0_i32, %c0_i32_0 : i32, i32
  }
  func.func @transform_6(%arg0: i32) -> (i32, i32) {
    %c0_i32 = arith.constant 0 : i32
    %c0_i32_0 = arith.constant 0 : i32
    %c0_i32_1 = arith.constant 0 : i32
    return %c0_i32, %c0_i32_0 : i32, i32
  }
  func.func @transform_7(%arg0: i32) -> (i32, i32) {
    %c0_i32 = arith.constant 0 : i32
    %c0_i32_0 = arith.constant 0 : i32
    %c0_i32_1 = arith.constant 0 : i32
    return %c0_i32, %c0_i32_0 : i32, i32
  }
  func.func @transform_8(%arg0: i32) -> (i32, i32) {
    %c0_i32 = arith.constant 0 : i32
    %c0_i32_0 = arith.constant 0 : i32
    %c0_i32_1 = arith.constant 0 : i32
    return %c0_i32, %c0_i32_0 : i32, i32
  }
  func.func @transform_9(%arg0: i32) -> (i32, i32) {
    %c0_i32 = arith.constant 0 : i32
    %c0_i32_0 = arith.constant 0 : i32
    %c0_i32_1 = arith.constant 0 : i32
    return %c0_i32, %c0_i32_0 : i32, i32
  }
}

</mosaic_0001>

<bundles_post_ra>
// kernel: tpu_custom_call.1
= control target key start
LH: loop header
LB: loop body
LE: loop exit
PB: predicated region body
PF: predicated region fallthrough
CT: control target
= control target key end

     0   :  { %15 = vsyncpa [#allocation4], 0  ;;  %s1237_s0 = inlined_call_operand.vmem [shape: f32[32,128], index: 0, kind: input, shape index: {}]   ;;  %s1238_s1 = inlined_call_operand.vmem [shape: f32[32,128], index: 1, kind: input, shape index: {}]   ;;  %s1239_s2 = inlined_call_operand.vmem [shape: f32[32,3], index: 2, kind: input, shape index: {}]   ;;  %s1240_s3 = inlined_call_operand.vmem [shape: f32[32,96], index: 3, kind: input, shape index: {}]   ;;  %s1241_s4 = inlined_call_operand.vmem [shape: f32[32,3], index: 4, kind: input, shape index: {}]   ;;  %s1242_s5 = inlined_call_operand.hbm [shape: f32[32,32], index: 5, kind: input, shape index: {}]   ;;  %s1243_s6 = inlined_call_operand.vmem [shape: f32[32,3], index: 6, kind: input, shape index: {}]   ;;  %s1244_s7 = inlined_call_operand.vmem [shape: f32[1,32], index: 7, kind: input, shape index: {}]   ;;  %s1245_s8 = inlined_call_operand.<no memory space> [shape: f32[1,1], index: 8, kind: input, shape index: {}]   ;;  %s1246_s9 = inlined_call_operand.hbm [shape: f32[1,128], index: 9, kind: output, shape index: {}]  }
   0x1   :  { %16 = vsyncpa [#allocation5], 0  ;;  %s944_s30 = smov [#allocation3]  }
   0x2   :  { %s32_s10 = sshll.u32 %s944_s30, 4  ;;  %s33_s10 = int_to_ptr.vmem [resolvable:$true] %s32_s10 }
   0x3   :  { %s908_s11 = scalar_lea.vmem %s33_s10, 512  ;;  %p913_p1 = scmp.lt.s32.totalorder %s33_s10, %s33_s10 }
   0x4   :  { %p909_p0 = scmp.ne.s32.totalorder %s33_s10, %s908_s11  ;;  %p914_p2 = scmp.lt.s32.totalorder %s908_s11, %s908_s11 }
   0x6   :  { %p915_p3 = por %p914_p2, %p913_p1 }
   0x8   :  { %p916_p4 = pnand %p915_p3, %p909_p0 }
   0xa   :  { %919 = shalt.err (!%p916_p4)
}
   0xb   :  { %s945_s12 = smov 128   ;;  %s946_s13 = smov 8  }
   0xc   :  { %38 = dma.hbm_to_vmem [thread:$0]  %s1242_s5, 512, %s33_s10, [#allocation4], %s945_s12, %s945_s12, %s946_s13  }
   0xd   :  { %940 = dma.done.wait [#allocation4], 512  }
   0xe   :  { %941 = vsyncadd [#allocation4], 4294966784  ;;  %v1012_v0 = vld [vmem:[%s1237_s0 + $0x18] sm:$0xff]  ;;  %v1017_v1 = vld [vmem:[%s1237_s0 + $0x8] sm:$0xff]  ;;  %s947_s20 = smov 126   ;;  %s948_s24 = smov 127   ;;  %v48_v30 = vlaneseq }
   0xf   :  { %80 = vrot.lane.b32.xlu0 %v1012_v0, %s947_s20  ;;  %76 = vrot.lane.b32.xlu1 %v1017_v1, %s947_s20  ;;  %v1024_v2 = vld [vmem:[%s1237_s0 + $0x10] sm:$0xff]  ;;  %v1029_v3 = vld [vmem:[%s1237_s0] sm:$0xff]  ;;  %s949_s25 = smov 1   ;;  %v950_v6 = vmov 0   ;;  %v951_v9 = vmov 1   ;;  %v952_v11 = vmov 2  }
  0x10   :  { %v82_v4 = vld [vmem:[%s1238_s1] sm:$0xff]  ;;  %v56_v5 = vld [vmem:[%s1239_s2 + $0x10] sm:$0xff]  ;;  %879 = vset.pattern.permute.xlu1 %v950_v6  ;;  %878 = vset.pattern.permute.xlu0 %v950_v6  ;;  %v57_v7 = vld [vmem:[%s1239_s2 + $0x18] sm:$0xff]  ;;  %v1090_v32 = vand.u32 127, %v48_v30  ;;  %vm294_vm7 = vcmask 785408   ;;  %vm477_vm8 = vcmask 261120  }
  0x11   :  { %805 = vmatprep.mubr.f32.mxu0 %v82_v4  ;;  %v55_v8 = vld [vmem:[%s1239_s2 + $0x8] sm:$0xff]  ;;  %v54_v10 = vld [vmem:[%s1239_s2] sm:$0xff]  ;;  %v84_v25 = vld [vmem:[%s1238_s1 + $0x10] sm:$0xff]  ;;  %vm954_vm14 = vmmov 0  }
  0x12   :  { %v83_v24 = vld [vmem:[%s1238_s1 + $0x8] sm:$0xff]  ;;  %v85_v26 = vld [vmem:[%s1238_s1 + $0x18] sm:$0xff]  ;;  %vm191_vm0 = vcmp.ge.s32.totalorder %v1090_v32, 1  ;;  %vm192_vm1 = vcmp.lt.s32.totalorder %v1090_v32, 14  ;;  %vm194_vm2 = vcmp.ge.s32.totalorder %v1090_v32, 17  ;;  %vm195_vm3 = vcmp.lt.s32.totalorder %v1090_v32, 30 }
  0x13   :  { %78 = vrot.lane.b32.xlu0 %v1024_v2, %s947_s20  ;;  %74 = vrot.lane.b32.xlu1 %v1029_v3, %s947_s20  ;;  %vm193_vm4 = vmand %vm191_vm0, %vm192_vm1  ;;  %vm392_vm9 = vcmp.lt.s32.totalorder %v1090_v32, 15  ;;  %vm394_vm10 = vcmp.lt.s32.totalorder %v1090_v32, 31  ;;  %s955_s1 = smov [#allocation6]  }
  0x14   :  { %vm196_vm5 = vmand %vm194_vm2, %vm195_vm3  ;;  %s706_s19 = sshll.u32 %s955_s1, 4  ;;  %s707_s19 = int_to_ptr.vmem [resolvable:$true] %s706_s19 }
  0x15   :  { %vm1100_vm6 = vmor %vm193_vm4, %vm196_vm5  ;;  %s920_s20 = scalar_lea.vmem %s707_s19, 16  ;;  %s924_s21 = scalar_lea.vmem %s707_s19, 32 }
  0x16   :  { %vm393_vm11 = vmand %vm191_vm0, %vm392_vm9  ;;  %p921_p5 = scmp.ne.s32.totalorder %s707_s19, %s920_s20  ;;  %p925_p6 = scmp.lt.s32.totalorder %s707_s19, %s707_s19 }
  0x17   :  { %72 = vrot.lane.b32.xlu0 %v1012_v0, %s948_s24  ;;  %70 = vrot.lane.b32.xlu1 %v1024_v2, %s948_s24  ;;  %vm395_vm12 = vmand %vm194_vm2, %vm394_vm10  ;;  %p926_p7 = scmp.lt.s32.totalorder %s924_s21, %s920_s20 }
  0x18   :  { %vm1208_vm13 = vmor %vm393_vm11, %vm395_vm12 }
  0x19   :  { %p927_p8 = por %p926_p7, %p925_p6 }
  0x1b   :  { %68 = vrot.lane.b32.xlu0 %v1017_v1, %s948_s24  ;;  %66 = vrot.lane.b32.xlu1 %v1029_v3, %s948_s24  ;;  %p928_p9 = pnand %p927_p8, %p921_p5 }
  0x1f   :  { %64 = vrot.lane.b32.xlu0 %v1012_v0, %s949_s25  ;;  %62 = vrot.lane.b32.xlu1 %v1024_v2, %s949_s25 }
  0x23   :  { %60 = vrot.lane.b32.xlu0 %v1017_v1, %s949_s25  ;;  %58 = vrot.lane.b32.xlu1 %v1029_v3, %s949_s25 }
  0x27   :  { %98 = vperm.xlu1 %879, %v56_v5   ;;  %103 = vperm.xlu0 %878, %v57_v7  }
  0x2b   :  { %93 = vperm.xlu1 %879, %v55_v8   ;;  %880 = vset.pattern.permute.xlu0 %v951_v9 }
  0x2c   :  { %219 = vperm.xlu0 %880, %v57_v7  }
  0x2f   :  { %88 = vperm.xlu1 %879, %v54_v10  }
  0x30   :  { %882 = vset.pattern.permute.xlu0 %v952_v11 }
  0x31   :  { %239 = vperm.xlu0 %882, %v57_v7  }
  0x33   :  { %881 = vset.pattern.permute.xlu1 %v951_v9 }
  0x34   :  { %215 = vperm.xlu1 %881, %v56_v5  }
  0x35   :  { %884 = vset.pattern.permute.xlu0 %v951_v9 }
  0x36   :  { %207 = vperm.xlu0 %884, %v54_v10  }
  0x38   :  { %211 = vperm.xlu1 %881, %v55_v8  }
  0x3a   :  { %885 = vset.pattern.permute.xlu0 %v950_v6 }
  0x3c   :  { %883 = vset.pattern.permute.xlu1 %v952_v11 }
  0x3d   :  { %235 = vperm.xlu1 %883, %v56_v5  }
  0x41   :  { %231 = vperm.xlu1 %883, %v55_v8  }
  0x45   :  { %227 = vperm.xlu1 %883, %v54_v10  }
  0x49   :  { %886 = vset.pattern.permute.xlu1 %v950_v6 }
  0x81   :  { %v81_v12 = vpop.permute.xlu0 %80  ;;  %v77_v13 = vpop.permute.xlu1 %76 }
  0x82   :  { %773 = vmatprep.subr.mxu0 %v81_v12 }
  0x83   :  { %774 = vmatpush3.msra.mxu0 %v81_v12 }
  0x85   :  { %v79_v14 = vpop.permute.xlu0 %78  ;;  %v75_v15 = vpop.permute.xlu1 %74 }
  0x86   :  { %775 = vmatprep.subr.mxu0 %v79_v14 }
  0x87   :  { %776 = vmatpush3.msra.mxu0 %v79_v14 }
  0x88   :  { %777 = vmatprep.subr.mxu0 %v77_v13 }
  0x89   :  { %778 = vmatpush3.msra.mxu0 %v77_v13  ;;  %v73_v16 = vpop.permute.xlu0 %72  ;;  %v71_v17 = vpop.permute.xlu1 %70  ;;  %v250_v13 = vld [vmem:[%s1241_s4] sm:$0xff] }
  0x8a   :  { %779 = vmatprep.subr.mxu0 %v75_v15 }
  0x8b   :  { %780 = vmatpush3.msra.mxu0 %v75_v15 }
  0x8c   :  { %781 = vmatprep.subr.mxu0 %v73_v16 }
  0x8d   :  { %782 = vmatpush3.msra.mxu0 %v73_v16  ;;  %v69_v18 = vpop.permute.xlu0 %68  ;;  %v67_v19 = vpop.permute.xlu1 %66 }
  0x8e   :  { %783 = vmatprep.subr.mxu0 %v71_v17 }
  0x8f   :  { %784 = vmatpush3.msra.mxu0 %v71_v17 }
  0x90   :  { %785 = vmatprep.subr.mxu0 %v69_v18 }
  0x91   :  { %786 = vmatpush3.msra.mxu0 %v69_v18  ;;  %v65_v20 = vpop.permute.xlu0 %64  ;;  %v63_v21 = vpop.permute.xlu1 %62 }
  0x92   :  { %787 = vmatprep.subr.mxu0 %v67_v19 }
  0x93   :  { %788 = vmatpush3.msra.mxu0 %v67_v19 }
  0x94   :  { %789 = vmatprep.subr.mxu0 %v1012_v0 }
  0x95   :  { %790 = vmatpush3.msra.mxu0 %v1012_v0  ;;  %v61_v22 = vpop.permute.xlu0 %60  ;;  %v59_v23 = vpop.permute.xlu1 %58 }
  0x96   :  { %791 = vmatprep.subr.mxu0 %v1024_v2 }
  0x97   :  { %792 = vmatpush3.msra.mxu0 %v1024_v2 }
  0x98   :  { %793 = vmatprep.subr.mxu0 %v1017_v1 }
  0x99   :  { %794 = vmatpush3.msra.mxu0 %v1017_v1 }
  0x9a   :  { %795 = vmatprep.subr.mxu0 %v1029_v3 }
  0x9b   :  { %796 = vmatpush3.msra.mxu0 %v1029_v3 }
  0x9c   :  { %797 = vmatprep.subr.mxu0 %v65_v20 }
  0x9d   :  { %798 = vmatpush3.msra.mxu0 %v65_v20 }
  0x9e   :  { %799 = vmatprep.subr.mxu0 %v63_v21 }
  0x9f   :  { %800 = vmatpush3.msra.mxu0 %v63_v21  ;;  %v271_v21 = vld [vmem:[%s1240_s3 + $0x8] sm:$0xff] }
  0xa0   :  { %801 = vmatprep.subr.mxu0 %v61_v22 }
  0xa1   :  { %802 = vmatpush3.msra.mxu0 %v61_v22  ;;  %v272_v22 = vld [vmem:[%s1240_s3 + $0x10] sm:$0xff] }
  0xa2   :  { %803 = vmatprep.subr.mxu0 %v59_v23  ;;  %v99_v27 = vpop.permute.xlu1 %98  ;;  %v104_v33 = vpop.permute.xlu0 %103 }
  0xa3   :  { %804 = vmatpush3.msra.mxu0 %v59_v23  ;;  %v273_v23 = vld [vmem:[%s1240_s3 + $0x18] sm:$0xff] }
  0xa4   :  { %806 = vmatmul.mubr.f32.vlgmr.msra.gmra.mxu0 %v83_v24  ;;  %v453_v24 = vld [vmem:[#allocation3] sm:$0xff] }
  0xa5   :  { %808 = vmatprep.mubr.f32.mxu0 %v84_v25  ;;  %v451_v25 = vld [vmem:[%s1243_s6 + $0x10] sm:$0xff] }
  0xa6   :  { %v94_v28 = vpop.permute.xlu1 %93 }
  0xa7   :  { %v220_v35 = vpop.permute.xlu0 %219 }
  0xa8   :  { %809 = vmatmul.mubr.f32.gmra.mxu0 %v85_v26  ;;  %v452_v26 = vld [vmem:[%s1243_s6 + $0x18] sm:$0xff] }
  0xaa   :  { %v89_v29 = vpop.permute.xlu1 %88 }
  0xac   :  { %v240_v43 = vpop.permute.xlu0 %239 }
  0xaf   :  { %v216_v31 = vpop.permute.xlu1 %215 }
  0xb1   :  { %v208_v55 = vpop.permute.xlu0 %207 }
  0xb3   :  { %v212_v34 = vpop.permute.xlu1 %211 }
  0xb8   :  { %v236_v39 = vpop.permute.xlu1 %235 }
  0xbc   :  { %v232_v50 = vpop.permute.xlu1 %231 }
  0xc0   :  { %v228_v62 = vpop.permute.xlu1 %227 }
 0x164   :  { %v807_v36 = vpop.f32.mrf.mxu0 }
 0x165   :  { %v178_v38 = vadd.f32 %v807_v36, %v94_v28  ;;  %v449_v28 = vld [vmem:[%s1243_s6] sm:$0xff] }
 0x166   :  { %v172_v40 = vpop.f32.mrf.mxu0 }
 0x167   :  { %v199_v41 = vsel %vm1100_vm6, %v178_v38, 0.0  ;;  %v173_v42 = vadd.f32 %v172_v40, %v89_v29 }
 0x168   :  { %v810_v44 = vpop.f32.mrf.mxu0  ;;  %v203_v47 = vmax.f32 %v199_v41, 0.0 }
 0x169   :  { %v198_v45 = vsel %vm1100_vm6, %v173_v42, 0.0  ;;  %v188_v46 = vadd.f32 %v810_v44, %v104_v33 }
 0x16a   :  { %v182_v48 = vpop.f32.mrf.mxu0  ;;  %v202_v53 = vmax.f32 %v198_v45, 0.0  ;;  %v223_v57 = vmul.f32 %v212_v34, %v203_v47 }
 0x16b   :  { %v201_v49 = vsel %vm1100_vm6, %v188_v46, 0.0  ;;  %v183_v51 = vadd.f32 %v182_v48, %v99_v27  ;;  %v450_v27 = vld [vmem:[%s1243_s6 + $0x8] sm:$0xff] }
 0x16c   :  { %v205_v52 = vmax.f32 %v201_v49, 0.0  ;;  %v222_v61 = vmul.f32 %v208_v55, %v202_v53  ;;  %v243_v4 = vadd.f32 %v232_v50, %v223_v57 }
 0x16d   :  { %v200_v54 = vsel %vm1100_vm6, %v183_v51, 0.0 }
 0x16e   :  { %v225_v56 = vmul.f32 %v220_v35, %v205_v52  ;;  %v204_v58 = vmax.f32 %v200_v54, 0.0  ;;  %v242_v8 = vadd.f32 %v228_v62, %v222_v61  ;;  %v1121_v10 = vadd.f32 %v243_v4, %v1017_v1  ;;  %v252_v1 = vld [vmem:[%s1241_s4 + $0x10] sm:$0xff] }
 0x170   :  { %v245_v59 = vadd.f32 %v240_v43, %v225_v56  ;;  %v224_v60 = vmul.f32 %v216_v31, %v204_v58  ;;  %v1126_v12 = vadd.f32 %v242_v8, %v1029_v3  ;;  %v251_v3 = vld [vmem:[%s1241_s4 + $0x8] sm:$0xff] }
 0x172   :  { %v1113_v63 = vadd.f32 %v245_v59, %v1012_v0  ;;  %v244_v5 = vadd.f32 %v236_v39, %v224_v60  ;;  %v270_v0 = vld [vmem:[%s1240_s3] sm:$0xff] }
 0x173   :  { %835 = vmatprep.mubr.msk.f32.mxu1 %vm294_vm7, %v270_v0 }
 0x174   :  { %v1116_v7 = vadd.f32 %v244_v5, %v1024_v2  ;;  %268 = vrot.lane.b32.xlu0 %v1113_v63, %s948_s24  ;;  %v253_v2 = vld [vmem:[%s1241_s4 + $0x18] sm:$0xff] }
 0x176   :  { %266 = vrot.lane.b32.xlu1 %v1116_v7, %s948_s24 }
 0x178   :  { %264 = vrot.lane.b32.xlu0 %v1121_v10, %s948_s24 }
 0x17a   :  { %262 = vrot.lane.b32.xlu1 %v1126_v12, %s948_s24 }
 0x17c   :  { %260 = vrot.lane.b32.xlu0 %v1113_v63, %s949_s25 }
 0x17e   :  { %258 = vrot.lane.b32.xlu1 %v1116_v7, %s949_s25 }
 0x180   :  { %256 = vrot.lane.b32.xlu0 %v1121_v10, %s949_s25 }
 0x182   :  { %254 = vrot.lane.b32.xlu1 %v1126_v12, %s949_s25 }
 0x184   :  { %291 = vperm.xlu0 %885, %v253_v2  }
 0x186   :  { %286 = vperm.xlu1 %886, %v252_v1  }
 0x188   :  { %887 = vset.pattern.permute.xlu0 %v951_v9 }
 0x189   :  { %418 = vperm.xlu0 %887, %v253_v2  }
 0x18a   :  { %281 = vperm.xlu1 %886, %v251_v3  }
 0x18d   :  { %889 = vset.pattern.permute.xlu0 %v952_v11 }
 0x18e   :  { %276 = vperm.xlu1 %886, %v250_v13   ;;  %438 = vperm.xlu0 %889, %v253_v2   ;;  %v454_v2 = vld [vmem:[#allocation3 + $0x8] sm:$0xff] }
 0x192   :  { %888 = vset.pattern.permute.xlu1 %v951_v9  ;;  %891 = vset.pattern.permute.xlu0 %v951_v9 }
 0x193   :  { %414 = vperm.xlu1 %888, %v252_v1   ;;  %406 = vperm.xlu0 %891, %v250_v13  }
 0x197   :  { %410 = vperm.xlu1 %888, %v251_v3   ;;  %892 = vset.pattern.permute.xlu0 %v950_v6 }
 0x198   :  { %474 = vperm.xlu0 %892, %v452_v26  }
 0x19b   :  { %890 = vset.pattern.permute.xlu1 %v952_v11 }
 0x19c   :  { %434 = vperm.xlu1 %890, %v252_v1   ;;  %894 = vset.pattern.permute.xlu0 %v951_v9 }
 0x19d   :  { %592 = vperm.xlu0 %894, %v452_v26  }
 0x1a0   :  { %430 = vperm.xlu1 %890, %v251_v3   ;;  %v455_v3 = vld [vmem:[#allocation3 + $0x10] sm:$0xff] }
 0x1a1   :  { %896 = vset.pattern.permute.xlu0 %v952_v11 }
 0x1a2   :  { %612 = vperm.xlu0 %896, %v452_v26  }
 0x1a4   :  { %426 = vperm.xlu1 %890, %v250_v13  }
 0x1a6   :  { %898 = vset.pattern.permute.xlu0 %v951_v9 }
 0x1a7   :  { %580 = vperm.xlu0 %898, %v449_v28  }
 0x1a8   :  { %893 = vset.pattern.permute.xlu1 %v950_v6 }
 0x1a9   :  { %469 = vperm.xlu1 %893, %v451_v25  }
 0x1ab   :  { %899 = vset.pattern.permute.xlu0 %v952_v11 }
 0x1ad   :  { %464 = vperm.xlu1 %893, %v450_v27  }
 0x1b1   :  { %459 = vperm.xlu1 %893, %v449_v28  }
 0x1b5   :  { %895 = vset.pattern.permute.xlu1 %v951_v9 }
 0x1b6   :  { %588 = vperm.xlu1 %895, %v451_v25  }
 0x1ba   :  { %584 = vperm.xlu1 %895, %v450_v27  }
 0x1be   :  { %897 = vset.pattern.permute.xlu1 %v952_v11 }
 0x1bf   :  { %608 = vperm.xlu1 %897, %v451_v25  }
 0x1c3   :  { %604 = vperm.xlu1 %897, %v450_v27  }
 0x1c7   :  { %600 = vperm.xlu1 %897, %v449_v28  }
 0x1e6   :  { %v269_v14 = vpop.permute.xlu0 %268 }
 0x1e7   :  { %811 = vmatprep.subr.mxu1 %v269_v14 }
 0x1e8   :  { %812 = vmatpush3.msra.mxu1 %v269_v14  ;;  %v267_v15 = vpop.permute.xlu1 %266 }
 0x1e9   :  { %813 = vmatprep.subr.mxu1 %v267_v15 }
 0x1ea   :  { %v265_v16 = vpop.permute.xlu0 %264  ;;  %814 = vmatpush3.msra.mxu1 %v267_v15 }
 0x1eb   :  { %815 = vmatprep.subr.mxu1 %v265_v16 }
 0x1ec   :  { %816 = vmatpush3.msra.mxu1 %v265_v16  ;;  %v263_v17 = vpop.permute.xlu1 %262 }
 0x1ed   :  { %817 = vmatprep.subr.mxu1 %v263_v17 }
 0x1ee   :  { %818 = vmatpush3.msra.mxu1 %v263_v17  ;;  %v261_v6 = vpop.permute.xlu0 %260 }
 0x1ef   :  { %819 = vmatprep.subr.mxu1 %v1113_v63 }
 0x1f0   :  { %820 = vmatpush3.msra.mxu1 %v1113_v63  ;;  %v259_v18 = vpop.permute.xlu1 %258 }
 0x1f1   :  { %821 = vmatprep.subr.mxu1 %v1116_v7 }
 0x1f2   :  { %822 = vmatpush3.msra.mxu1 %v1116_v7  ;;  %v257_v19 = vpop.permute.xlu0 %256 }
 0x1f3   :  { %823 = vmatprep.subr.mxu1 %v1121_v10 }
 0x1f4   :  { %824 = vmatpush3.msra.mxu1 %v1121_v10  ;;  %v255_v20 = vpop.permute.xlu1 %254 }
 0x1f5   :  { %825 = vmatprep.subr.mxu1 %v1126_v12 }
 0x1f6   :  { %826 = vmatpush3.msra.mxu1 %v1126_v12 }
 0x1f7   :  { %827 = vmatprep.subr.mxu1 %v261_v6 }
 0x1f8   :  { %828 = vmatpush3.msra.mxu1 %v261_v6 }
 0x1f9   :  { %829 = vmatprep.subr.mxu1 %v259_v18 }
 0x1fa   :  { %830 = vmatpush3.msra.mxu1 %v259_v18 }
 0x1fb   :  { %831 = vmatprep.subr.mxu1 %v257_v19 }
 0x1fc   :  { %832 = vmatpush3.msra.mxu1 %v257_v19 }
 0x1fd   :  { %833 = vmatprep.subr.mxu1 %v255_v20 }
 0x1fe   :  { %834 = vmatpush3.msra.mxu1 %v255_v20 }
 0x1ff   :  { %836 = vmatmul.mubr.msk.f32.vlgmr.msra.gmra.mxu1 %vm294_vm7, %v271_v21  ;;  %v292_v34 = vpop.permute.xlu0 %291 }
 0x200   :  { %838 = vmatprep.mubr.msk.f32.mxu1 %vm294_vm7, %v272_v22 }
 0x201   :  { %v287_v29 = vpop.permute.xlu1 %286 }
 0x203   :  { %839 = vmatmul.mubr.msk.f32.gmra.mxu1 %vm294_vm7, %v273_v23 }
 0x204   :  { %849 = vmatprep.mubr.msk.f32.mxu1 %vm477_vm8, %v453_v24  ;;  %v419_v9 = vpop.permute.xlu0 %418 }
 0x205   :  { %v282_v30 = vpop.permute.xlu1 %281 }
 0x209   :  { %v277_v31 = vpop.permute.xlu1 %276  ;;  %v439_v42 = vpop.permute.xlu0 %438 }
 0x20e   :  { %v415_v33 = vpop.permute.xlu1 %414  ;;  %v407_v53 = vpop.permute.xlu0 %406 }
 0x212   :  { %v411_v35 = vpop.permute.xlu1 %410 }
 0x213   :  { %v475_v15 = vpop.permute.xlu0 %474 }
 0x217   :  { %v435_v38 = vpop.permute.xlu1 %434 }
 0x218   :  { %v593_v17 = vpop.permute.xlu0 %592 }
 0x21b   :  { %v431_v48 = vpop.permute.xlu1 %430 }
 0x21d   :  { %v613_v20 = vpop.permute.xlu0 %612 }
 0x21f   :  { %v427_v60 = vpop.permute.xlu1 %426 }
 0x2bf   :  { %v837_v11 = vpop.f32.mrf.mxu1 }
 0x2c0   :  { %v379_v37 = vadd.f32 %v837_v11, %v282_v30 }
 0x2c1   :  { %v373_v39 = vpop.f32.mrf.mxu1 }
 0x2c2   :  { %v398_v40 = vsel %vm1208_vm13, %v379_v37, 0.0  ;;  %v374_v41 = vadd.f32 %v373_v39, %v277_v31  ;;  %v581_v31 = vpop.permute.xlu0 %580 }
 0x2c3   :  { %v840_v43 = vpop.f32.mrf.mxu1  ;;  %v402_v32 = vmax.f32 %v398_v40, 0.0 }
 0x2c4   :  { %v397_v44 = vsel %vm1208_vm13, %v374_v41, 0.0  ;;  %v389_v45 = vadd.f32 %v840_v43, %v292_v34 }
 0x2c5   :  { %v383_v46 = vpop.f32.mrf.mxu1  ;;  %v401_v51 = vmax.f32 %v397_v44, 0.0  ;;  %v422_v55 = vmul.f32 %v411_v35, %v402_v32  ;;  %v625_v32 = vstv %s1245_s8 }
 0x2c6   :  { %v400_v47 = vsel %vm1208_vm13, %v389_v45, 0.0  ;;  %v384_v49 = vadd.f32 %v383_v46, %v287_v29  ;;  %v623_v45 = vld [vmem:[%s1244_s7] sm:$0x1] }
 0x2c7   :  { %v404_v50 = vmax.f32 %v400_v47, 0.0  ;;  %v421_v58 = vmul.f32 %v407_v53, %v401_v51  ;;  %v442_v61 = vadd.f32 %v431_v48, %v422_v55 }
 0x2c8   :  { %v399_v52 = vsel %vm1208_vm13, %v384_v49, 0.0 }
 0x2c9   :  { %v424_v54 = vmul.f32 %v419_v9, %v404_v50  ;;  %v403_v56 = vmax.f32 %v399_v52, 0.0  ;;  %v441_v5 = vadd.f32 %v427_v60, %v421_v58  ;;  %v446_v0 = vadd.f32 %v442_v61, %v1121_v10  ;;  %v470_v10 = vpop.permute.xlu1 %469 }
 0x2cb   :  { %v423_v57 = vmul.f32 %v415_v33, %v403_v56  ;;  %v444_v59 = vadd.f32 %v439_v42, %v424_v54  ;;  %v445_v1 = vadd.f32 %v441_v5, %v1126_v12 }
 0x2cd   :  { %v448_v62 = vadd.f32 %v444_v59, %v1113_v63  ;;  %v443_v4 = vadd.f32 %v435_v38, %v423_v57  ;;  %v456_v63 = vld [vmem:[#allocation3 + $0x18] sm:$0xff]  ;;  %v465_v13 = vpop.permute.xlu1 %464 }
 0x2cf   :  { %841 = vmatprep.subr.mxu1 %v448_v62  ;;  %v447_v8 = vadd.f32 %v443_v4, %v1116_v7  ;;  %v953_v7 = vmov 0.0  }
 0x2d0   :  { %842 = vmatpush3.msra.mxu1 %v448_v62  ;;  %855 = vmatprep.subr.mxu0 %v953_v7 }
 0x2d1   :  { %843 = vmatprep.subr.mxu1 %v447_v8  ;;  %863 = vmatprep.mubr.msk.f32.mxu0 %vm954_vm14, %v953_v7  ;;  %v460_v12 = vpop.permute.xlu1 %459 }
 0x2d2   :  { %844 = vmatpush3.msra.mxu1 %v447_v8 }
 0x2d3   :  { %845 = vmatprep.subr.mxu1 %v446_v0 }
 0x2d4   :  { %846 = vmatpush3.msra.mxu1 %v446_v0 }
 0x2d5   :  { %847 = vmatprep.subr.mxu1 %v445_v1  ;;  %v589_v14 = vpop.permute.xlu1 %588 }
 0x2d6   :  { %848 = vmatpush3.msra.mxu1 %v445_v1 }
 0x2d7   :  { %850 = vmatmul.mubr.msk.f32.vlgmr.msra.gmra.mxu1 %vm477_vm8, %v454_v2 }
 0x2d8   :  { %852 = vmatprep.mubr.msk.f32.mxu1 %vm477_vm8, %v455_v3 }
 0x2d9   :  { %v585_v16 = vpop.permute.xlu1 %584 }
 0x2db   :  { %853 = vmatmul.mubr.msk.f32.gmra.mxu1 %vm477_vm8, %v456_v63 }
 0x2dd   :  { %v609_v18 = vpop.permute.xlu1 %608 }
 0x2e1   :  { %v605_v26 = vpop.permute.xlu1 %604 }
 0x2e5   :  { %v601_v37 = vpop.permute.xlu1 %600 }
 0x397   :  { %v851_v6 = vpop.f32.mrf.mxu1 }
 0x398   :  { %v562_v19 = vadd.f32 %v851_v6, %v465_v13 }
 0x399   :  { %v556_v21 = vpop.f32.mrf.mxu1 }
 0x39a   :  { %v557_v22 = vadd.f32 %v556_v21, %v460_v12  ;;  %v576_v24 = vmax.f32 %v562_v19, 0.0 }
 0x39b   :  { %v854_v23 = vpop.f32.mrf.mxu1 }
 0x39c   :  { %v572_v25 = vadd.f32 %v854_v23, %v475_v15  ;;  %v575_v28 = vmax.f32 %v557_v22, 0.0  ;;  %v596_v34 = vmul.f32 %v585_v16, %v576_v24 }
 0x39d   :  { %v566_v27 = vpop.f32.mrf.mxu1 }
 0x39e   :  { %v578_v29 = vmax.f32 %v572_v25, 0.0  ;;  %v567_v30 = vadd.f32 %v566_v27, %v470_v10  ;;  %v595_v11 = vmul.f32 %v581_v31, %v575_v28  ;;  %v616_v39 = vadd.f32 %v605_v26, %v596_v34 }
 0x3a0   :  { %v598_v33 = vmul.f32 %v593_v17, %v578_v29  ;;  %v577_v35 = vmax.f32 %v567_v30, 0.0  ;;  %v615_v42 = vadd.f32 %v601_v37, %v595_v11  ;;  %v620_v43 = vadd.f32 %v616_v39, %v446_v0 }
 0x3a2   :  { %v618_v9 = vadd.f32 %v613_v20, %v598_v33  ;;  %v597_v36 = vmul.f32 %v589_v14, %v577_v35  ;;  %v619_v44 = vadd.f32 %v615_v42, %v445_v1 }
 0x3a4   :  { %v622_v38 = vadd.f32 %v618_v9, %v448_v62  ;;  %v617_v40 = vadd.f32 %v609_v18, %v597_v36 }
 0x3a6   :  { %v621_v41 = vadd.f32 %v617_v40, %v447_v8  ;;  %856 = vmatpush3.msra.mxu0 %v622_v38 }
 0x3a7   :  { %857 = vmatprep.subr.mxu0 %v953_v7 }
 0x3a8   :  { %858 = vmatpush3.msra.mxu0 %v621_v41 }
 0x3a9   :  { %859 = vmatprep.subr.mxu0 %v953_v7 }
 0x3aa   :  { %860 = vmatpush3.msra.mxu0 %v620_v43 }
 0x3ab   :  { %861 = vmatprep.subr.mxu0 %v953_v7 }
 0x3ac   :  { %862 = vmatpush3.msra.mxu0 %v619_v44 }
 0x3ad   :  { %864 = vmatmul.mubr.msk.f32.vlgmr.msra.gmra.mxu0 %vm477_vm8, %v623_v45 }
 0x46d   :  { %v695_v46 = vpop.f32.mrf.mxu0 }
 0x46e   :  { %v696_v47 = vadd.f32 %v695_v46, %v625_v32 }
 0x46f   :  { %v865_v48 = vpop.f32.mrf.mxu0 }
 0x470   :  { %699 = vst [vmem:[#allocation6] sm:$0x1] %v696_v47 }
 0x471   :  { %931 = shalt.err (!%p928_p9)
}
 0x472   :  { %709 = dma.vmem_to_hbm [thread:$0]  %s707_s19, 16, %s1246_s9, [#allocation5]  }
 0x473   :  { %942 = dma.done.wait [#allocation5], 16  }
 0x474   :  { %943 = vsyncadd [#allocation5], 4294967280 }
 0x475   :  { %713 = vsyncpa [#allocation4], 1 }
 0x476   :  { %714 = vsyncpa [#allocation5], 1 }

</bundles_post_ra>
